<compile_context>
chip_gen: v7x
topology: tpu7x:2x2x1
jax: 0.10.0
libtpu: 0.0.40
codegen_flags: <defaults>
</compile_context>

<pallas_src>
import jax
import jax.numpy as jnp
from jax.experimental import pallas as pl
from jax.experimental.pallas import tpu as pltpu


def _linear_self_attn_kernel(x_ref, w_ref, m_ref, b_ref, o_ref):
    # x_ref : (TB, L, D)  input dtype (f32 or bf16)
    # w_ref : (1, D)      f32  -- nn.Linear(D, 1) weight, shared across steps
    # m_ref : (TB, L)     f32  -- 1.0 where padded
    # b_ref : (1,)        f32  -- scalar bias (SMEM)
    # o_ref : (TB, L)     f32
    x = x_ref[...].astype(jnp.float32)        # upcast after DMA (v5e has no bf16 VPU)
    w = w_ref[...]                            # (1, D) broadcasts against (TB, L, D)

    # scores[b, l] = sum_d x[b, l, d] * w[d] + bias
    # VPU multiply + lane reduce over D (no MXU push, no materialized transpose).
    scores = jnp.sum(x * w, axis=-1) + b_ref[0]              # (TB, L) f32

    # masked_fill_(x_mask, -inf)
    scores = jnp.where(m_ref[...] != 0.0, -jnp.inf, scores)

    # softmax over the sequence axis
    m_max = jnp.max(scores, axis=-1, keepdims=True)
    e = jnp.exp(scores - m_max)
    denom = jnp.sum(e, axis=-1, keepdims=True)
    # EUP approx reciprocal: normalization is effectively free (VPU slot untouched).
    o_ref[...] = e * pl.reciprocal(denom, approx=True)


def _choose_block_batch(B, L, D, itemsize, target_bytes=2 * 1024 * 1024):
    """Pick TB so the x tile is ~target_bytes (double-buffered stays far under
    the 32 MiB scoped VMEM default, hence also v7x-safe)."""
    per_row = max(1, L * D * itemsize)
    tb = max(1, min(B, target_bytes // per_row))
    if tb >= B:
        return B
    # Keep the (8, 128) sublane rule for the (TB, L) mask/output blocks:
    # TB must be a multiple of 8 (or equal B) and divide B evenly.
    tb = (tb // 8) * 8
    while tb >= 8:
        if B % tb == 0:
            return tb
        tb -= 8
    return B  # TODO(synk): pad ragged batches instead of falling back to one block.


def linear_self_attention_forward(x, x_mask, weight, bias):
    """x: (B, L, D) f32/bf16; x_mask: (B, L) bool/int (True/1 = padded).
    weight: (1, D) (PyTorch nn.Linear(D, 1) layout); bias: (1,).
    Returns alpha: (B, L) f32 = softmax over L of masked linear scores."""
    B, L, D = x.shape
    assert weight.shape == (1, D) and bias.shape == (1,)

    w2 = weight.astype(jnp.float32)                 # (1, D), shared
    b1 = bias.astype(jnp.float32)                   # (1,), SMEM scalar
    # Mask traffic is 1/D of x traffic; kept f32 for layout safety.
    m2 = x_mask.astype(jnp.float32)                 # (B, L)
    # NOTE: x is deliberately NOT upcast here -- it is DMA'd in its native
    # dtype (bf16 halves HBM traffic) and upcast inside the kernel.

    TB = _choose_block_batch(B, L, D, jnp.dtype(x.dtype).itemsize)
    grid = (B // TB,)

    out = pl.pallas_call(
        _linear_self_attn_kernel,
        out_shape=jax.ShapeDtypeStruct((B, L), jnp.float32),
        grid_spec=pltpu.PrefetchScalarGridSpec(
            num_scalar_prefetch=0,
            grid=grid,
            in_specs=[
                pl.BlockSpec((TB, L, D), lambda i: (i, 0, 0)),      # x (native dtype)
                pl.BlockSpec((1, D), lambda i: (0, 0)),             # weight (shared)
                pl.BlockSpec((TB, L), lambda i: (i, 0)),            # mask
                pl.BlockSpec(memory_space=pltpu.MemorySpace.SMEM),  # bias scalar
            ],
            out_specs=pl.BlockSpec((TB, L), lambda i: (i, 0)),      # lane-dense slab
        ),
        compiler_params=pltpu.CompilerParams(
            dimension_semantics=("parallel",)),                     # megacore/dual-TC
    )(x, w2, m2, b1)

    return out


def _reference(x, x_mask, weight, bias):
    s = jnp.einsum("bld,d->bl",
                   x.astype(jnp.float32), weight[0].astype(jnp.float32)) + bias[0]
    s = jnp.where(x_mask, -jnp.inf, s)
    return jax.nn.softmax(s, axis=1)


if __name__ == "__main__":
    # Small shapes: batch=2, seq=8, input_size=32
    B, L, D = 2, 8, 32
    key = jax.random.PRNGKey(0)
    kx, kw, kb = jax.random.split(key, 3)

    x = jax.random.normal(kx, (B, L, D), dtype=jnp.float32)
    # nn.Linear(input_size, 1) parameters (PyTorch layout).
    weight = jax.random.normal(kw, (1, D), dtype=jnp.float32) * 0.1
    bias = jax.random.normal(kb, (1,), dtype=jnp.float32) * 0.1
    # Mask out the tail positions (True = padding), varying per batch element.
    x_mask = jnp.stack([
        jnp.arange(L) >= 6,
        jnp.arange(L) >= 5,
    ]).astype(jnp.bool_)

    # f32 input path.
    alpha = jax.block_until_ready(
        linear_self_attention_forward(x, x_mask, weight, bias))
    ref = _reference(x, x_mask, weight, bias)
    assert jnp.allclose(alpha, ref, atol=2e-3, rtol=2e-3), (alpha, ref)
    # Masked positions must receive exactly zero probability.
    assert bool(jnp.all(jnp.where(x_mask, alpha, 0.0) == 0.0))

    # bf16 input path: x stays bf16 through the HBM->VMEM DMA (half traffic),
    # upcast to f32 inside the kernel before multiply/reduce.
    x_bf16 = x.astype(jnp.bfloat16)
    alpha_bf = jax.block_until_ready(
        linear_self_attention_forward(x_bf16, x_mask, weight, bias))
    ref_bf = _reference(x_bf16.astype(jnp.float32), x_mask, weight, bias)
    assert jnp.allclose(alpha_bf, ref_bf, atol=2e-2, rtol=2e-2)

    print("KERNEL_OK")
</pallas_src>

<mosaic_0001>
module attributes {stable_mosaic.version = 11 : i64} {
  func.func @_linear_self_attn_kernel(%arg0: i32, %arg1: memref<2x8x32xf32, #tpu.memory_space<vmem>>, %arg2: memref<1x32xf32, #tpu.memory_space<vmem>>, %arg3: memref<2x8xf32, #tpu.memory_space<vmem>>, %arg4: memref<1xf32, #tpu.memory_space<smem>>, %arg5: memref<2x8xf32, #tpu.memory_space<vmem>>) attributes {dimension_semantics = [#tpu.dimension_semantics<parallel>], iteration_bounds = array<i64: 1>, scalar_prefetch = 0 : i64, scratch_operands = 0 : i64, tpu.core_type = #tpu.core_type<tc>, window_params = [{transform_indices = @transform_0, window_bounds = array<i64: 2, 8, 32>}, {pipeline_mode = #tpu.pipeline_mode<synchronous>, transform_indices = @transform_1, window_bounds = array<i64: 1, 32>}, {transform_indices = @transform_2, window_bounds = array<i64: 2, 8>}, {transform_indices = @transform_3, window_bounds = array<i64: 1>}, {transform_indices = @transform_4, window_bounds = array<i64: 2, 8>}]} {
    %c0 = arith.constant 0 : index
    %c0_0 = arith.constant 0 : index
    %c0_1 = arith.constant 0 : index
    %0 = vector.load %arg1[%c0, %c0_0, %c0_1] : memref<2x8x32xf32, #tpu.memory_space<vmem>>, vector<2x8x32xf32>
    %c0_2 = arith.constant 0 : index
    %c0_3 = arith.constant 0 : index
    %1 = vector.load %arg2[%c0_2, %c0_3] : memref<1x32xf32, #tpu.memory_space<vmem>>, vector<1x32xf32>
    %2 = vector.shape_cast %1 : vector<1x32xf32> to vector<1x1x32xf32>
    %3 = vector.broadcast %2 : vector<1x1x32xf32> to vector<2x8x32xf32>
    %4 = arith.mulf %0, %3 : vector<2x8x32xf32>
    %cst = arith.constant dense<0.000000e+00> : vector<2x8xf32>
    %5 = vector.multi_reduction <add>, %4, %cst [2] : vector<2x8x32xf32> to vector<2x8xf32>
    %c0_4 = arith.constant 0 : index
    %6 = memref.load %arg4[%c0_4] : memref<1xf32, #tpu.memory_space<smem>>
    %7 = vector.broadcast %6 : f32 to vector<2x8xf32>
    %8 = arith.addf %5, %7 : vector<2x8xf32>
    %c0_5 = arith.constant 0 : index
    %c0_6 = arith.constant 0 : index
    %9 = vector.load %arg3[%c0_5, %c0_6] : memref<2x8xf32, #tpu.memory_space<vmem>>, vector<2x8xf32>
    %cst_7 = arith.constant 0.000000e+00 : f32
    %10 = vector.broadcast %cst_7 : f32 to vector<2x8xf32>
    %11 = arith.cmpf one, %9, %10 : vector<2x8xf32>
    %cst_8 = arith.constant 0xFF800000 : f32
    %12 = vector.broadcast %cst_8 : f32 to vector<2x8xf32>
    %13 = arith.select %11, %12, %8 : vector<2x8xi1>, vector<2x8xf32>
    %cst_9 = arith.constant dense<0xFF800000> : vector<2xf32>
    %14 = vector.multi_reduction <maximumf>, %13, %cst_9 [1] : vector<2x8xf32> to vector<2xf32>
    %15 = vector.shape_cast %14 : vector<2xf32> to vector<2x1xf32>
    %16 = vector.broadcast %15 : vector<2x1xf32> to vector<2x8xf32>
    %17 = arith.subf %13, %16 : vector<2x8xf32>
    %18 = math.exp %17 : vector<2x8xf32>
    %cst_10 = arith.constant dense<0.000000e+00> : vector<2xf32>
    %19 = vector.multi_reduction <add>, %18, %cst_10 [1] : vector<2x8xf32> to vector<2xf32>
    %20 = vector.shape_cast %19 : vector<2xf32> to vector<2x1xf32>
    %21 = tpu.reciprocal %20 {approx = true} : vector<2x1xf32> -> vector<2x1xf32>
    %22 = vector.broadcast %21 : vector<2x1xf32> to vector<2x8xf32>
    %23 = arith.mulf %18, %22 : vector<2x8xf32>
    %c0_11 = arith.constant 0 : index
    %c0_12 = arith.constant 0 : index
    %24 = vector.load %arg5[%c0_11, %c0_12] : memref<2x8xf32, #tpu.memory_space<vmem>>, vector<2x8xf32>
    tpu.vector_store %arg5[%c0_11, %c0_12], %23 {strides = array<i32>} : memref<2x8xf32, #tpu.memory_space<vmem>>, vector<2x8xf32>,
    return
  }
  func.func @transform_0(%arg0: i32) -> (i32, i32, i32) {
    %c0_i32 = arith.constant 0 : i32
    %c0_i32_0 = arith.constant 0 : i32
    %c0_i32_1 = arith.constant 0 : i32
    return %arg0, %c0_i32, %c0_i32_0 : i32, i32, i32
  }
  func.func @transform_1(%arg0: i32) -> (i32, i32) {
    %c0_i32 = arith.constant 0 : i32
    %c0_i32_0 = arith.constant 0 : i32
    %c0_i32_1 = arith.constant 0 : i32
    return %c0_i32, %c0_i32_0 : i32, i32
  }
  func.func @transform_2(%arg0: i32) -> (i32, i32) {
    %c0_i32 = arith.constant 0 : i32
    %c0_i32_0 = arith.constant 0 : i32
    return %arg0, %c0_i32 : i32, i32
  }
  func.func @transform_3(%arg0: i32) -> i32 {
    %c0_i32 = arith.constant 0 : i32
    %c0_i32_0 = arith.constant 0 : i32
    return %c0_i32 : i32
  }
  func.func @transform_4(%arg0: i32) -> (i32, i32) {
    %c0_i32 = arith.constant 0 : i32
    %c0_i32_0 = arith.constant 0 : i32
    return %arg0, %c0_i32 : i32, i32
  }
}

</mosaic_0001>

<bundles_post_ra>
// kernel: tpu_custom_call.1
= control target key start
LH: loop header
LB: loop body
LE: loop exit
PB: predicated region body
PF: predicated region fallthrough
CT: control target
= control target key end

     0   :  { %10 = vsyncpa [#allocation4], 0  ;;  %s223_s0 = inlined_call_operand.hbm [shape: f32[2,8,32], index: 0, kind: input, shape index: {}]   ;;  %s224_s1 = inlined_call_operand.vmem [shape: f32[1,32], index: 1, kind: input, shape index: {}]   ;;  %s225_s2 = inlined_call_operand.vmem [shape: f32[2,8], index: 2, kind: input, shape index: {}]   ;;  %s226_s3 = inlined_call_operand.<no memory space> [shape: f32[1], index: 3, kind: input, shape index: {}]   ;;  %s227_s4 = inlined_call_operand.hbm [shape: f32[2,8], index: 4, kind: output, shape index: {}]  }
   0x1   :  { %11 = vsyncpa [#allocation5], 0  ;;  %s158_s15 = smov [#allocation3]   ;;  %s110_s19 = scalar_lea.hbm %s223_s0, 256 }
   0x2   :  { %s17_s16 = sshll.u32 %s158_s15, 4  ;;  %p111_p0 = scmp.ne.s32.totalorder %s223_s0, %s110_s19  ;;  %s18_s16 = int_to_ptr.vmem [resolvable:$true] %s17_s16 }
   0x3   :  { %p114_p1 = scmp.lt.u32.totalorder %s110_s19, %s223_s0 }
   0x5   :  { %p116_p2 = pnand %p114_p1, %p111_p0 }
   0x7   :  { %119 = shalt.err (!%p116_p2)
}
   0x8   :  { %s120_s24 = scalar_lea.vmem %s18_s16, 256  ;;  %p125_p4 = scmp.lt.s32.totalorder %s18_s16, %s18_s16 }
   0x9   :  { %p121_p3 = scmp.ne.s32.totalorder %s18_s16, %s120_s24  ;;  %p126_p5 = scmp.lt.s32.totalorder %s120_s24, %s120_s24 }
   0xb   :  { %p127_p6 = por %p126_p5, %p125_p4 }
   0xd   :  { %p128_p7 = pnand %p127_p6, %p121_p3 }
   0xf   :  { %131 = shalt.err (!%p128_p7)
}
  0x10   :  { %s159_s25 = smov 128   ;;  %s160_s26 = smov 8  }
  0x11   :  { %23 = dma.hbm_to_vmem [thread:$0]  %s223_s0, 256, %s18_s16, [#allocation4], %s159_s25, %s159_s25, %s160_s26  }
  0x12   :  { %154 = dma.done.wait [#allocation4], 256  }
  0x13   :  { %155 = vsyncadd [#allocation4], 4294967040  ;;  %v33_v0 = vld [vmem:[#allocation3] sm:$0xff]  ;;  %vm44_vm0 = vcmask 261120   ;;  %v34_v2 = vld [vmem:[#allocation3 + $0x8] sm:$0xff]  ;;  %v59_v7 = vlaneseq  ;;  %v52_v10 = vstv %s226_s3  ;;  %vm69_vm1 = vcmask 1041409  }
  0x14   :  { %v101_v1 = vld [vmem:[%s224_s1] ss:$0 sm:$0xff]  ;;  %vm73_vm3 = vcmask 58368  }
  0x15   :  { %v42_v3 = vmul.f32 %v101_v1, %v33_v0  ;;  %v43_v4 = vmul.f32 %v101_v1, %v34_v2  ;;  %v60_v8 = vand.u32 127, %v59_v7  ;;  %v62_v9 = vshrl.u32 %v59_v7, 7  ;;  %v55_v15 = vld [vmem:[%s225_s2] sm:$0x3]  ;;  %s161_s2 = smov [#allocation6]  }
  0x16   :  { %vm56_vm2 = vcmp.ne.f32.partialorder %v55_v15, 0.0  ;;  %s92_s3 = sshll.u32 %s161_s2, 4  ;;  %s93_s3 = int_to_ptr.vmem [resolvable:$true] %s92_s3 }
  0x17   :  { %v45_v5 = vsel %vm44_vm0, %v42_v3, 0.0  ;;  %v48_v6 = vsel %vm44_vm0, %v43_v4, 0.0  ;;  %v63_v12 = vsub.s32 %v60_v8, %v62_v9  ;;  %s132_s7 = scalar_lea.vmem %s93_s3, 32  ;;  %p137_p9 = scmp.lt.s32.totalorder %s93_s3, %s93_s3 }
  0x18   :  { %46 = vadd.xlane.f32.xlu0 %v45_v5  ;;  %p133_p8 = scmp.ne.s32.totalorder %s93_s3, %s132_s7  ;;  %p138_p10 = scmp.lt.s32.totalorder %s132_s7, %s132_s7 }
  0x1a   :  { %p139_p11 = por %p138_p10, %p137_p9 }
  0x1c   :  { %49 = vadd.xlane.f32.xlu0 %v48_v6  ;;  %p140_p12 = pnand %p139_p11, %p133_p8 }
  0xa5   :  { %v47_v11 = vpop.xlane.xlu0 %46 }
  0xa6   :  { %v53_v13 = vadd.f32 %v52_v10, %v47_v11 }
  0xa8   :  { %v64_v17 = vrot.slane %v53_v13, %v63_v12 }
  0xa9   :  { %v50_v14 = vpop.xlane.xlu0 %49 }
  0xaa   :  { %v54_v16 = vadd.f32 %v52_v10, %v50_v14 }
  0xac   :  { %v68_v18 = vrot.slane %v54_v16, %v63_v12 }
  0xae   :  { %v70_v19 = vsel %vm69_vm1, %v68_v18, %v64_v17 }
  0xaf   :  { %v72_v20 = vsel %vm56_vm2, -inf, %v70_v19 }
  0xb0   :  { %v74_v21 = vsel %vm73_vm3, %v72_v20, -inf }
  0xb1   :  { %75 = vmax.xlane.f32.xlu1 %v74_v21 }
 0x13e   :  { %v76_v22 = vpop.xlane.xlu1 %75 }
 0x13f   :  { %v77_v23 = vsub.f32 %v72_v20, %v76_v22 }
 0x141   :  { %v78_v24 = vmul.f32 1.442695, %v77_v23 }
 0x143   :  { %106 = vpow2.f32 %v78_v24 }
 0x14d   :  { %v107_v25 = vpop.eup %106 }
 0x14e   :  { %v80_v26 = vsel %vm73_vm3, %v107_v25, 0.0 }
 0x14f   :  { %81 = vadd.xlane.f32.xlu1 %v80_v26 }
 0x1dc   :  { %v82_v27 = vpop.xlane.xlu1 %81 }
 0x1dd   :  { %108 = vrcp.f32 %v82_v27 }
 0x1e7   :  { %v109_v28 = vpop.eup %108 }
 0x1e8   :  { %v84_v29 = vmul.f32 %v109_v28, %v107_v25 }
 0x1ea   :  { %85 = vst.msk [vmem:[#allocation6] sm:$0x3] %vm73_vm3, %v84_v29 }
 0x1eb   :  { %143 = shalt.err (!%p140_p12)
}
 0x1ec   :  { %s144_s10 = scalar_lea.hbm %s227_s4, 32 }
 0x1ed   :  { %p145_p13 = scmp.ne.s32.totalorder %s227_s4, %s144_s10  ;;  %p148_p0 = scmp.lt.u32.totalorder %s144_s10, %s227_s4 }
 0x1ef   :  { %p150_p1 = pnand %p148_p0, %p145_p13 }
 0x1f1   :  { %153 = shalt.err (!%p150_p1)
}
 0x1f2   :  { %95 = dma.vmem_to_hbm [thread:$0]  %s93_s3, 32, %s227_s4, [#allocation5]  }
 0x1f3   :  { %156 = dma.done.wait [#allocation5], 32  }
 0x1f4   :  { %157 = vsyncadd [#allocation5], 4294967264 }
 0x1f5   :  { %99 = vsyncpa [#allocation4], 1 }
 0x1f6   :  { %100 = vsyncpa [#allocation5], 1 }

</bundles_post_ra>
